<compile_context>
chip_gen: v7x
topology: tpu7x:2x2x1
jax: 0.10.0
libtpu: 0.0.40
codegen_flags: <defaults>
</compile_context>

<pallas_src>
import functools

import numpy as np
import jax
import jax.numpy as jnp
from jax import lax
from jax.experimental import pallas as pl
from jax.experimental.pallas import tpu as pltpu

_F32_EPS = float(np.finfo(np.float32).eps)   # SACPolicy.__eps
_LOG_2PI = float(np.log(2.0 * np.pi))


def _round_up(x, m):
    return ((x + m - 1) // m) * m


def _sac_forward_kernel(obs_ref, noise_ref, w1_ref, b1_ref, w2_ref, b2_ref,
                        wh_ref, bh_ref, scale_ref, out_ref, *, action_dim):
    w_dt = w1_ref.dtype

    # ---- actor MLP trunk (bf16 lane-dense MXU operands, f32 accumulation) ----
    h1 = jnp.dot(obs_ref[...], w1_ref[...],
                 preferred_element_type=jnp.float32) + b1_ref[...]
    h1 = jnp.maximum(h1, 0.0)
    h2 = jnp.dot(h1.astype(w_dt), w2_ref[...],
                 preferred_element_type=jnp.float32) + b2_ref[...]
    h2 = jnp.maximum(h2, 0.0)

    # ---- fused Gaussian heads: one matmul -> [mu | log_std], lane-aligned halves ----
    heads = jnp.dot(h2.astype(w_dt), wh_ref[...],
                    preferred_element_type=jnp.float32) + bh_ref[...]
    half = wh_ref.shape[1] // 2          # padded action width (multiple of 128)
    mu = heads[:, :half]
    log_std = jnp.clip(heads[:, half:], -20.0, 2.0)
    std = jnp.exp(log_std)

    tb = mu.shape[0]
    lane = lax.broadcasted_iota(jnp.int32, (tb, half), 1)
    valid = lane < action_dim            # true action lanes; padded lanes masked out

    # ---- rsample: host-provided standard-normal noise (zeros => dist.mode()) ----
    noise = noise_ref[...]
    action = mu + std * noise
    squashed = jnp.tanh(action)          # padded lanes: tanh(0) == 0

    # ---- diagonal Gaussian log_prob; z == noise exactly (action = mu + std*noise) ----
    lp = -0.5 * (noise * noise) - log_std - 0.5 * _LOG_2PI
    log_prob = jnp.sum(jnp.where(valid, lp, 0.0), axis=-1, keepdims=True)

    # ---- tanh-squash Jacobian correction ----
    corr = jnp.log(scale_ref[...] * (1.0 - squashed * squashed) + _F32_EPS)
    log_prob = log_prob - jnp.sum(jnp.where(valid, corr, 0.0), axis=-1, keepdims=True)

    # ---- lane-dense packed output: lanes [0, A) = action, lane A = log_prob ----
    out_ref[...] = jnp.where(lane == action_dim, log_prob, squashed)


def prepare_params(raw, action_scale, weight_dtype=jnp.bfloat16):
    """Pad obs/hidden dims to 128 multiples, fuse mu|log_std heads, cast weights to bf16."""
    w1, b1, w2, b2 = raw["w1"], raw["b1"], raw["w2"], raw["b2"]
    wmu, bmu, wls, bls = raw["wmu"], raw["bmu"], raw["wls"], raw["bls"]
    obs_dim, H = w1.shape
    A = wmu.shape[1]

    obs_pad = _round_up(obs_dim, 128)
    h_pad = _round_up(H, 128)
    out_w = _round_up(A + 1, 128)        # room for [action lanes | log_prob lane], lane-dense
    pad_a = out_w - A

    w1_p = jnp.pad(w1, ((0, obs_pad - obs_dim), (0, h_pad - H)))
    b1_p = jnp.pad(b1, ((0, 0), (0, h_pad - H)))
    w2_p = jnp.pad(w2, ((0, h_pad - H), (0, h_pad - H)))
    b2_p = jnp.pad(b2, ((0, 0), (0, h_pad - H)))

    wmu_p = jnp.pad(wmu, ((0, h_pad - H), (0, pad_a)))
    wls_p = jnp.pad(wls, ((0, h_pad - H), (0, pad_a)))
    bmu_p = jnp.pad(bmu, ((0, 0), (0, pad_a)))
    bls_p = jnp.pad(bls, ((0, 0), (0, pad_a)))
    w_head = jnp.concatenate([wmu_p, wls_p], axis=1)      # [h_pad, 2*out_w]
    b_head = jnp.concatenate([bmu_p, bls_p], axis=1)      # [1, 2*out_w]
    scale_p = jnp.pad(action_scale, ((0, 0), (0, pad_a)), constant_values=1.0)

    return dict(
        w1=w1_p.astype(weight_dtype), b1=b1_p.astype(jnp.float32),
        w2=w2_p.astype(weight_dtype), b2=b2_p.astype(jnp.float32),
        w_head=w_head.astype(weight_dtype), b_head=b_head.astype(jnp.float32),
        action_scale=scale_p.astype(jnp.float32),
        obs_dim=obs_dim, obs_pad=obs_pad, action_dim=A, out_width=out_w)


def _choose_batch_tiling(B, batch_tile):
    """Pick (TB, B_pad): minimal row padding, and >=2 grid steps when B >= 16 so the
    'parallel' batch axis can shard across both TensorCores on v7x."""
    B8 = _round_up(B, 8)
    n_steps = max(1, -(-B8 // batch_tile))
    if n_steps == 1 and B8 >= 16:
        n_steps = 2
    TB = _round_up(-(-B8 // n_steps), 8)
    return TB, n_steps * TB


def sac_policy_forward(obs, params, *, key=None, deterministic=False, batch_tile=1024):
    """Returns (squashed_action [B, A], log_prob [B, 1])."""
    B = obs.shape[0]
    obs_dim, obs_pad = params["obs_dim"], params["obs_pad"]
    A = params["action_dim"]
    out_w = params["out_width"]
    h_pad = params["w1"].shape[1]
    head_w = params["w_head"].shape[1]

    TB, B_pad = _choose_batch_tiling(B, batch_tile)
    grid = (B_pad // TB,)

    # obs streamed lane-dense in bf16 (the only per-step input DMA that scales with B).
    obs_p = jnp.zeros((B_pad, obs_pad), jnp.bfloat16)
    obs_p = obs_p.at[:B, :obs_dim].set(obs.astype(jnp.bfloat16))

    # Noise generated host-side; deterministic => zeros (exact dist.mode(), no EUP sampling).
    if deterministic:
        noise_p = jnp.zeros((B_pad, out_w), jnp.float32)
    else:
        if key is None:
            raise ValueError("stochastic forward requires a PRNG key")
        noise = jax.random.normal(key, (B, A), jnp.float32)
        noise_p = jnp.zeros((B_pad, out_w), jnp.float32).at[:B, :A].set(noise)

    def batch_map(i):
        return (i, 0)

    def fixed_map(i):
        return (0, 0)          # weight/bias blocks stay VMEM-resident across steps

    weight_keys = ("w1", "b1", "w2", "b2", "w_head", "b_head", "action_scale")
    weight_bytes = sum(int(params[k].size) * params[k].dtype.itemsize for k in weight_keys)
    cost = pl.CostEstimate(
        flops=int(2 * B_pad * (obs_pad * h_pad + h_pad * h_pad + h_pad * head_w)
                  + 12 * B_pad * out_w),
        transcendentals=int(3 * B_pad * out_w),       # exp + tanh + log per head lane
        bytes_accessed=int(obs_p.size * 2 + noise_p.size * 4 + weight_bytes
                           + B_pad * out_w * 4),
    )

    kernel = functools.partial(_sac_forward_kernel, action_dim=A)

    out = pl.pallas_call(
        kernel,
        out_shape=jax.ShapeDtypeStruct((B_pad, out_w), jnp.float32),
        grid=grid,
        in_specs=[
            pl.BlockSpec((TB, obs_pad), batch_map),
            pl.BlockSpec((TB, out_w), batch_map),
            pl.BlockSpec(params["w1"].shape, fixed_map),
            pl.BlockSpec(params["b1"].shape, fixed_map),
            pl.BlockSpec(params["w2"].shape, fixed_map),
            pl.BlockSpec(params["b2"].shape, fixed_map),
            pl.BlockSpec(params["w_head"].shape, fixed_map),
            pl.BlockSpec(params["b_head"].shape, fixed_map),
            pl.BlockSpec(params["action_scale"].shape, fixed_map),
        ],
        out_specs=pl.BlockSpec((TB, out_w), batch_map),
        compiler_params=pltpu.CompilerParams(
            dimension_semantics=("parallel",),
        ),
        cost_estimate=cost,
    )(obs_p, noise_p,
      params["w1"], params["b1"], params["w2"], params["b2"],
      params["w_head"], params["b_head"], params["action_scale"])

    return out[:B, :A], out[:B, A:A + 1]


def init_actor_params(key, obs_dim, hidden, action_dim):
    """PyTorch nn.Linear-style uniform init, deterministic from `key`."""
    def linear(k, fan_in, fan_out):
        k_w, k_b = jax.random.split(k)
        bound = 1.0 / np.sqrt(fan_in)
        w = jax.random.uniform(k_w, (fan_in, fan_out), jnp.float32, -bound, bound)
        b = jax.random.uniform(k_b, (1, fan_out), jnp.float32, -bound, bound)
        return w, b

    keys = jax.random.split(key, 4)
    w1, b1 = linear(keys[0], obs_dim, hidden)
    w2, b2 = linear(keys[1], hidden, hidden)
    wmu, bmu = linear(keys[2], hidden, action_dim)
    wls, bls = linear(keys[3], hidden, action_dim)
    return dict(w1=w1, b1=b1, w2=w2, b2=b2, wmu=wmu, bmu=bmu, wls=wls, bls=bls)


def reference_forward(obs, raw_params, action_scale, noise, weight_dtype):
    """Pure-JAX reference matching the kernel math (same bf16 weight/obs cast)."""
    def mm(x, w):
        return jnp.dot(x.astype(weight_dtype), w.astype(weight_dtype),
                       preferred_element_type=jnp.float32)
    h1 = jax.nn.relu(mm(obs, raw_params["w1"]) + raw_params["b1"])
    h2 = jax.nn.relu(mm(h1, raw_params["w2"]) + raw_params["b2"])
    mu = mm(h2, raw_params["wmu"]) + raw_params["bmu"]
    log_std = jnp.clip(mm(h2, raw_params["wls"]) + raw_params["bls"], -20.0, 2.0)
    std = jnp.exp(log_std)
    action = mu + std * noise
    lp = jnp.sum(-0.5 * noise * noise - log_std - 0.5 * _LOG_2PI, axis=-1, keepdims=True)
    sq = jnp.tanh(action)
    lp = lp - jnp.sum(jnp.log(action_scale * (1.0 - sq * sq) + _F32_EPS),
                      axis=-1, keepdims=True)
    return sq, lp


if __name__ == "__main__":
    B, OBS_DIM, HIDDEN, ACT_DIM = 8, 16, 32, 4

    key = jax.random.PRNGKey(0)
    k_param, k_obs, k_noise = jax.random.split(key, 3)

    raw_params = init_actor_params(k_param, OBS_DIM, HIDDEN, ACT_DIM)
    obs = jax.random.normal(k_obs, (B, OBS_DIM), jnp.float32)

    # action_space: high = +2, low = -2  ->  scale = (high - low) / 2 = 2
    action_high = 2.0 * np.ones((ACT_DIM,), np.float32)
    action_low = -2.0 * np.ones((ACT_DIM,), np.float32)
    action_scale = jnp.asarray((action_high - action_low) / 2.0).reshape(1, ACT_DIM)

    params = prepare_params(raw_params, action_scale, weight_dtype=jnp.bfloat16)

    # Stochastic path (dist.rsample): noise is host-generated from k_noise, so the kernel
    # output can be checked exactly against the pure-JAX reference with the same noise.
    squashed_action, log_prob = sac_policy_forward(obs, params, key=k_noise,
                                                   deterministic=False)
    jax.block_until_ready((squashed_action, log_prob))
    assert squashed_action.shape == (B, ACT_DIM)
    assert log_prob.shape == (B, 1)
    noise = jax.random.normal(k_noise, (B, ACT_DIM), jnp.float32)
    ref_action, ref_log_prob = reference_forward(obs, raw_params, action_scale,
                                                 noise, jnp.bfloat16)
    np.testing.assert_allclose(np.asarray(squashed_action), np.asarray(ref_action),
                               rtol=1e-2, atol=1e-2)
    np.testing.assert_allclose(np.asarray(log_prob), np.asarray(ref_log_prob),
                               rtol=1e-2, atol=2e-2)
    assert bool(jnp.all(jnp.abs(squashed_action) <= 1.0))

    # Deterministic path (dist.mode()).
    det_action, det_log_prob = sac_policy_forward(obs, params, deterministic=True)
    jax.block_until_ready((det_action, det_log_prob))
    ref_action, ref_log_prob = reference_forward(
        obs, raw_params, action_scale, jnp.zeros((B, ACT_DIM), jnp.float32), jnp.bfloat16)
    np.testing.assert_allclose(np.asarray(det_action), np.asarray(ref_action),
                               rtol=1e-2, atol=1e-2)
    np.testing.assert_allclose(np.asarray(det_log_prob), np.asarray(ref_log_prob),
                               rtol=1e-2, atol=2e-2)

    print("KERNEL_OK")
</pallas_src>

<mosaic_0001>
module attributes {stable_mosaic.version = 11 : i64} {
  func.func @_sac_forward_kernel(%arg0: i32, %arg1: memref<8x128xbf16, #tpu.memory_space<vmem>>, %arg2: memref<8x128xf32, #tpu.memory_space<vmem>>, %arg3: memref<128x128xbf16, #tpu.memory_space<vmem>>, %arg4: memref<1x128xf32, #tpu.memory_space<vmem>>, %arg5: memref<128x128xbf16, #tpu.memory_space<vmem>>, %arg6: memref<1x128xf32, #tpu.memory_space<vmem>>, %arg7: memref<128x256xbf16, #tpu.memory_space<vmem>>, %arg8: memref<1x256xf32, #tpu.memory_space<vmem>>, %arg9: memref<1x128xf32, #tpu.memory_space<vmem>>, %arg10: memref<8x128xf32, #tpu.memory_space<vmem>>) attributes {dimension_semantics = [#tpu.dimension_semantics<parallel>], iteration_bounds = array<i64: 1>, scalar_prefetch = 0 : i64, scratch_operands = 0 : i64, tpu.core_type = #tpu.core_type<tc>, window_params = [{transform_indices = @transform_0, window_bounds = array<i64: 8, 128>}, {transform_indices = @transform_1, window_bounds = array<i64: 8, 128>}, {pipeline_mode = #tpu.pipeline_mode<synchronous>, transform_indices = @transform_2, window_bounds = array<i64: 128, 128>}, {pipeline_mode = #tpu.pipeline_mode<synchronous>, transform_indices = @transform_3, window_bounds = array<i64: 1, 128>}, {pipeline_mode = #tpu.pipeline_mode<synchronous>, transform_indices = @transform_4, window_bounds = array<i64: 128, 128>}, {pipeline_mode = #tpu.pipeline_mode<synchronous>, transform_indices = @transform_5, window_bounds = array<i64: 1, 128>}, {pipeline_mode = #tpu.pipeline_mode<synchronous>, transform_indices = @transform_6, window_bounds = array<i64: 128, 256>}, {pipeline_mode = #tpu.pipeline_mode<synchronous>, transform_indices = @transform_7, window_bounds = array<i64: 1, 256>}, {pipeline_mode = #tpu.pipeline_mode<synchronous>, transform_indices = @transform_8, window_bounds = array<i64: 1, 128>}, {transform_indices = @transform_9, window_bounds = array<i64: 8, 128>}]} {
    %c0 = arith.constant 0 : index
    %c0_0 = arith.constant 0 : index
    %0 = vector.load %arg1[%c0, %c0_0] : memref<8x128xbf16, #tpu.memory_space<vmem>>, vector<8x128xbf16>
    %c0_1 = arith.constant 0 : index
    %c0_2 = arith.constant 0 : index
    %1 = vector.load %arg3[%c0_1, %c0_2] : memref<128x128xbf16, #tpu.memory_space<vmem>>, vector<128x128xbf16>
    %cst = arith.constant dense<0.000000e+00> : vector<8x128xf32>
    %2 = tpu.matmul %0, %1, %cst {dimension_numbers = #tpu.dot_dimension_numbers<[1], [0], [0], [1], [0, 0, 1, 1], [], []>} : vector<8x128xbf16>, vector<128x128xbf16>, vector<8x128xf32> -> vector<8x128xf32>
    %c0_3 = arith.constant 0 : index
    %c0_4 = arith.constant 0 : index
    %3 = vector.load %arg4[%c0_3, %c0_4] : memref<1x128xf32, #tpu.memory_space<vmem>>, vector<1x128xf32>
    %4 = vector.broadcast %3 : vector<1x128xf32> to vector<8x128xf32>
    %5 = arith.addf %2, %4 : vector<8x128xf32>
    %cst_5 = arith.constant 0.000000e+00 : f32
    %6 = vector.broadcast %cst_5 : f32 to vector<8x128xf32>
    %7 = arith.maximumf %5, %6 : vector<8x128xf32>
    %8 = arith.truncf %7 : vector<8x128xf32> to vector<8x128xbf16>
    %c0_6 = arith.constant 0 : index
    %c0_7 = arith.constant 0 : index
    %9 = vector.load %arg5[%c0_6, %c0_7] : memref<128x128xbf16, #tpu.memory_space<vmem>>, vector<128x128xbf16>
    %cst_8 = arith.constant dense<0.000000e+00> : vector<8x128xf32>
    %10 = tpu.matmul %8, %9, %cst_8 {dimension_numbers = #tpu.dot_dimension_numbers<[1], [0], [0], [1], [0, 0, 1, 1], [], []>} : vector<8x128xbf16>, vector<128x128xbf16>, vector<8x128xf32> -> vector<8x128xf32>
    %c0_9 = arith.constant 0 : index
    %c0_10 = arith.constant 0 : index
    %11 = vector.load %arg6[%c0_9, %c0_10] : memref<1x128xf32, #tpu.memory_space<vmem>>, vector<1x128xf32>
    %12 = vector.broadcast %11 : vector<1x128xf32> to vector<8x128xf32>
    %13 = arith.addf %10, %12 : vector<8x128xf32>
    %cst_11 = arith.constant 0.000000e+00 : f32
    %14 = vector.broadcast %cst_11 : f32 to vector<8x128xf32>
    %15 = arith.maximumf %13, %14 : vector<8x128xf32>
    %16 = arith.truncf %15 : vector<8x128xf32> to vector<8x128xbf16>
    %c0_12 = arith.constant 0 : index
    %c0_13 = arith.constant 0 : index
    %17 = vector.load %arg7[%c0_12, %c0_13] : memref<128x256xbf16, #tpu.memory_space<vmem>>, vector<128x256xbf16>
    %cst_14 = arith.constant dense<0.000000e+00> : vector<8x256xf32>
    %18 = tpu.matmul %16, %17, %cst_14 {dimension_numbers = #tpu.dot_dimension_numbers<[1], [0], [0], [1], [0, 0, 1, 1], [], []>} : vector<8x128xbf16>, vector<128x256xbf16>, vector<8x256xf32> -> vector<8x256xf32>
    %c0_15 = arith.constant 0 : index
    %c0_16 = arith.constant 0 : index
    %19 = vector.load %arg8[%c0_15, %c0_16] : memref<1x256xf32, #tpu.memory_space<vmem>>, vector<1x256xf32>
    %20 = vector.broadcast %19 : vector<1x256xf32> to vector<8x256xf32>
    %21 = arith.addf %18, %20 : vector<8x256xf32>
    %22 = vector.extract_strided_slice %21 {offsets = [0, 0], sizes = [8, 128], strides = [1, 1]} : vector<8x256xf32> to vector<8x128xf32>
    %23 = vector.extract_strided_slice %21 {offsets = [0, 128], sizes = [8, 128], strides = [1, 1]} : vector<8x256xf32> to vector<8x128xf32>
    %cst_17 = arith.constant -2.000000e+01 : f32
    %cst_18 = arith.constant 2.000000e+00 : f32
    %24 = vector.broadcast %cst_17 : f32 to vector<8x128xf32>
    %25 = arith.maximumf %24, %23 : vector<8x128xf32>
    %26 = vector.broadcast %cst_18 : f32 to vector<8x128xf32>
    %27 = arith.minimumf %26, %25 : vector<8x128xf32>
    %28 = math.exp %27 : vector<8x128xf32>
    %29 = tpu.iota {dimensions = array<i32: 1>} : vector<8x128xi32>
    %c4_i32 = arith.constant 4 : i32
    %30 = vector.broadcast %c4_i32 : i32 to vector<8x128xi32>
    %31 = arith.cmpi slt, %29, %30 : vector<8x128xi32>
    %c0_19 = arith.constant 0 : index
    %c0_20 = arith.constant 0 : index
    %32 = vector.load %arg2[%c0_19, %c0_20] : memref<8x128xf32, #tpu.memory_space<vmem>>, vector<8x128xf32>
    %33 = arith.mulf %28, %32 : vector<8x128xf32>
    %34 = arith.addf %22, %33 : vector<8x128xf32>
    %35 = math.tanh %34 : vector<8x128xf32>
    %36 = arith.mulf %32, %32 : vector<8x128xf32>
    %cst_21 = arith.constant -5.000000e-01 : f32
    %37 = vector.broadcast %cst_21 : f32 to vector<8x128xf32>
    %38 = arith.mulf %37, %36 : vector<8x128xf32>
    %39 = arith.subf %38, %27 : vector<8x128xf32>
    %cst_22 = arith.constant 0.918938517 : f32
    %40 = vector.broadcast %cst_22 : f32 to vector<8x128xf32>
    %41 = arith.subf %39, %40 : vector<8x128xf32>
    %cst_23 = arith.constant 0.000000e+00 : f32
    %42 = vector.broadcast %cst_23 : f32 to vector<8x128xf32>
    %43 = arith.select %31, %41, %42 : vector<8x128xi1>, vector<8x128xf32>
    %cst_24 = arith.constant dense<0.000000e+00> : vector<8xf32>
    %44 = vector.multi_reduction <add>, %43, %cst_24 [1] : vector<8x128xf32> to vector<8xf32>
    %45 = vector.shape_cast %44 : vector<8xf32> to vector<8x1xf32>
    %c0_25 = arith.constant 0 : index
    %c0_26 = arith.constant 0 : index
    %46 = vector.load %arg9[%c0_25, %c0_26] : memref<1x128xf32, #tpu.memory_space<vmem>>, vector<1x128xf32>
    %47 = arith.mulf %35, %35 : vector<8x128xf32>
    %cst_27 = arith.constant 1.000000e+00 : f32
    %48 = vector.broadcast %cst_27 : f32 to vector<8x128xf32>
    %49 = arith.subf %48, %47 : vector<8x128xf32>
    %50 = vector.broadcast %46 : vector<1x128xf32> to vector<8x128xf32>
    %51 = arith.mulf %50, %49 : vector<8x128xf32>
    %cst_28 = arith.constant 1.1920929E-7 : f32
    %52 = vector.broadcast %cst_28 : f32 to vector<8x128xf32>
    %53 = arith.addf %51, %52 : vector<8x128xf32>
    %54 = math.log %53 : vector<8x128xf32>
    %cst_29 = arith.constant 0.000000e+00 : f32
    %55 = vector.broadcast %cst_29 : f32 to vector<8x128xf32>
    %56 = arith.select %31, %54, %55 : vector<8x128xi1>, vector<8x128xf32>
    %cst_30 = arith.constant dense<0.000000e+00> : vector<8xf32>
    %57 = vector.multi_reduction <add>, %56, %cst_30 [1] : vector<8x128xf32> to vector<8xf32>
    %58 = vector.shape_cast %57 : vector<8xf32> to vector<8x1xf32>
    %59 = arith.subf %45, %58 : vector<8x1xf32>
    %c4_i32_31 = arith.constant 4 : i32
    %60 = vector.broadcast %c4_i32_31 : i32 to vector<8x128xi32>
    %61 = arith.cmpi eq, %29, %60 : vector<8x128xi32>
    %62 = vector.shape_cast %59 : vector<8x1xf32> to vector<8x1xf32>
    %63 = vector.broadcast %62 : vector<8x1xf32> to vector<8x128xf32>
    %64 = arith.select %61, %63, %35 : vector<8x128xi1>, vector<8x128xf32>
    %c0_32 = arith.constant 0 : index
    %c0_33 = arith.constant 0 : index
    %65 = vector.load %arg10[%c0_32, %c0_33] : memref<8x128xf32, #tpu.memory_space<vmem>>, vector<8x128xf32>
    tpu.vector_store %arg10[%c0_32, %c0_33], %64 {strides = array<i32>} : memref<8x128xf32, #tpu.memory_space<vmem>>, vector<8x128xf32>,
    return
  }
  func.func @transform_0(%arg0: i32) -> (i32, i32) {
    %c0_i32 = arith.constant 0 : i32
    %c0_i32_0 = arith.constant 0 : i32
    return %arg0, %c0_i32 : i32, i32
  }
  func.func @transform_1(%arg0: i32) -> (i32, i32) {
    %c0_i32 = arith.constant 0 : i32
    %c0_i32_0 = arith.constant 0 : i32
    return %arg0, %c0_i32 : i32, i32
  }
  func.func @transform_2(%arg0: i32) -> (i32, i32) {
    %c0_i32 = arith.constant 0 : i32
    %c0_i32_0 = arith.constant 0 : i32
    %c0_i32_1 = arith.constant 0 : i32
    return %c0_i32, %c0_i32_0 : i32, i32
  }
  func.func @transform_3(%arg0: i32) -> (i32, i32) {
    %c0_i32 = arith.constant 0 : i32
    %c0_i32_0 = arith.constant 0 : i32
    %c0_i32_1 = arith.constant 0 : i32
    return %c0_i32, %c0_i32_0 : i32, i32
  }
  func.func @transform_4(%arg0: i32) -> (i32, i32) {
    %c0_i32 = arith.constant 0 : i32
    %c0_i32_0 = arith.constant 0 : i32
    %c0_i32_1 = arith.constant 0 : i32
    return %c0_i32, %c0_i32_0 : i32, i32
  }
  func.func @transform_5(%arg0: i32) -> (i32, i32) {
    %c0_i32 = arith.constant 0 : i32
    %c0_i32_0 = arith.constant 0 : i32
    %c0_i32_1 = arith.constant 0 : i32
    return %c0_i32, %c0_i32_0 : i32, i32
  }
  func.func @transform_6(%arg0: i32) -> (i32, i32) {
    %c0_i32 = arith.constant 0 : i32
    %c0_i32_0 = arith.constant 0 : i32
    %c0_i32_1 = arith.constant 0 : i32
    return %c0_i32, %c0_i32_0 : i32, i32
  }
  func.func @transform_7(%arg0: i32) -> (i32, i32) {
    %c0_i32 = arith.constant 0 : i32
    %c0_i32_0 = arith.constant 0 : i32
    %c0_i32_1 = arith.constant 0 : i32
    return %c0_i32, %c0_i32_0 : i32, i32
  }
  func.func @transform_8(%arg0: i32) -> (i32, i32) {
    %c0_i32 = arith.constant 0 : i32
    %c0_i32_0 = arith.constant 0 : i32
    %c0_i32_1 = arith.constant 0 : i32
    return %c0_i32, %c0_i32_0 : i32, i32
  }
  func.func @transform_9(%arg0: i32) -> (i32, i32) {
    %c0_i32 = arith.constant 0 : i32
    %c0_i32_0 = arith.constant 0 : i32
    return %arg0, %c0_i32 : i32, i32
  }
}

</mosaic_0001>

<bundles_post_ra>
// kernel: tpu_custom_call.1
= control target key start
LH: loop header
LB: loop body
LE: loop exit
PB: predicated region body
PF: predicated region fallthrough
CT: control target
= control target key end

     0   :  { %14 = vsyncpa [#allocation3], 0  ;;  %s977_s0 = inlined_call_operand.hbm [shape: bf16[8,128], index: 0, kind: input, shape index: {}]   ;;  %s978_s1 = inlined_call_operand.hbm [shape: f32[8,128], index: 1, kind: input, shape index: {}]   ;;  %s979_s2 = inlined_call_operand.hbm [shape: bf16[128,128], index: 2, kind: input, shape index: {}]   ;;  %s980_s3 = inlined_call_operand.vmem [shape: f32[1,128], index: 3, kind: input, shape index: {}]   ;;  %s981_s4 = inlined_call_operand.hbm [shape: bf16[128,128], index: 4, kind: input, shape index: {}]   ;;  %s982_s5 = inlined_call_operand.vmem [shape: f32[1,128], index: 5, kind: input, shape index: {}]   ;;  %s983_s6 = inlined_call_operand.hbm [shape: bf16[128,256], index: 6, kind: input, shape index: {}]   ;;  %s984_s7 = inlined_call_operand.vmem [shape: f32[1,256], index: 7, kind: input, shape index: {}]   ;;  %s985_s8 = inlined_call_operand.vmem [shape: f32[1,128], index: 8, kind: input, shape index: {}]   ;;  %s986_s9 = inlined_call_operand.hbm [shape: f32[8,128], index: 9, kind: output, shape index: {}]  }
   0x1   :  { %15 = vsyncpa [#allocation6], 0 }
   0x2   :  { %16 = vsyncpa [#allocation9], 0 }
   0x3   :  { %17 = vsyncpa [#allocation4], 0  ;;  %s822_s30 = smov [#allocation5]   ;;  %s682_s13 = scalar_lea.hbm %s978_s1, 128 }
   0x4   :  { %s34_s10 = sshll.u32 %s822_s30, 4  ;;  %p683_p0 = scmp.ne.s32.totalorder %s978_s1, %s682_s13  ;;  %s35_s10 = int_to_ptr.vmem [resolvable:$true] %s34_s10 }
   0x5   :  { %p686_p1 = scmp.lt.u32.totalorder %s682_s13, %s978_s1 }
   0x7   :  { %p688_p2 = pnand %p686_p1, %p683_p0 }
   0x9   :  { %691 = shalt.err (!%p688_p2)
}
   0xa   :  { %s692_s18 = scalar_lea.vmem %s35_s10, 128  ;;  %p697_p4 = scmp.lt.s32.totalorder %s35_s10, %s35_s10 }
   0xb   :  { %p693_p3 = scmp.ne.s32.totalorder %s35_s10, %s692_s18  ;;  %p698_p5 = scmp.lt.s32.totalorder %s692_s18, %s692_s18 }
   0xd   :  { %p699_p6 = por %p698_p5, %p697_p4 }
   0xf   :  { %p700_p7 = pnand %p699_p6, %p693_p3 }
  0x11   :  { %703 = shalt.err (!%p700_p7)
}
  0x12   :  { %37 = dma.hbm_to_vmem [thread:$0]  %s978_s1, 128, %s35_s10, [#allocation6]  }
  0x13   :  { %s823_s21 = smov [#allocation8]   ;;  %s824_s23 = smov [#allocation2]  }
  0x14   :  { %s57_s22 = sshll.u32 %s823_s21, 4  ;;  %s24_s24 = sshll.u32 %s824_s23, 4  ;;  %s58_s22 = int_to_ptr.vmem [resolvable:$true] %s57_s22  ;;  %s25_s24 = int_to_ptr.vmem [resolvable:$true] %s24_s24 }
  0x15   :  { %s704_s27 = scalar_lea.hbm %s981_s4, 1024 }
  0x16   :  { %p705_p8 = scmp.ne.s32.totalorder %s981_s4, %s704_s27  ;;  %p708_p9 = scmp.lt.u32.totalorder %s704_s27, %s981_s4 }
  0x18   :  { %p710_p10 = pnand %p708_p9, %p705_p8 }
  0x1a   :  { %713 = shalt.err (!%p710_p10)
}
  0x1b   :  { %s714_s1 = scalar_lea.vmem %s58_s22, 1024  ;;  %p719_p12 = scmp.lt.s32.totalorder %s58_s22, %s58_s22 }
  0x1c   :  { %p715_p11 = scmp.ne.s32.totalorder %s58_s22, %s714_s1  ;;  %p720_p13 = scmp.lt.s32.totalorder %s714_s1, %s714_s1 }
  0x1e   :  { %p721_p0 = por %p720_p13, %p719_p12 }
  0x20   :  { %p722_p1 = pnand %p721_p0, %p715_p11 }
  0x22   :  { %725 = shalt.err (!%p722_p1)
}
  0x23   :  { %s825_s10 = smov 64   ;;  %s826_s12 = smov 4  }
  0x24   :  { %63 = dma.hbm_to_vmem [thread:$0]  %s981_s4, 1024, %s58_s22, [#allocation9], %s825_s10, %s825_s10, %s826_s12  }
  0x25   :  { %s726_s17 = scalar_lea.hbm %s977_s0, 64 }
  0x26   :  { %p727_p2 = scmp.ne.s32.totalorder %s977_s0, %s726_s17  ;;  %p730_p3 = scmp.lt.u32.totalorder %s726_s17, %s977_s0 }
  0x28   :  { %p732_p4 = pnand %p730_p3, %p727_p2 }
  0x2a   :  { %735 = shalt.err (!%p732_p4)
}
  0x2b   :  { %s736_s23 = scalar_lea.vmem %s25_s24, 64  ;;  %p741_p6 = scmp.lt.s32.totalorder %s25_s24, %s25_s24 }
  0x2c   :  { %p737_p5 = scmp.ne.s32.totalorder %s25_s24, %s736_s23  ;;  %p742_p7 = scmp.lt.s32.totalorder %s736_s23, %s736_s23 }
  0x2e   :  { %p743_p8 = por %p742_p7, %p741_p6 }
  0x30   :  { %p744_p9 = pnand %p743_p8, %p737_p5 }
  0x32   :  { %747 = shalt.err (!%p744_p9)
}
  0x33   :  { %27 = dma.hbm_to_vmem [thread:$0]  %s977_s0, 64, %s25_s24, [#allocation3]  }
  0x34   :  { %s827_s25 = smov [#allocation7]   ;;  %s828_s27 = smov [#allocation10]  }
  0x35   :  { %s43_s26 = sshll.u32 %s827_s25, 4  ;;  %s71_s28 = sshll.u32 %s828_s27, 4  ;;  %s44_s26 = int_to_ptr.vmem [resolvable:$true] %s43_s26  ;;  %s72_s28 = int_to_ptr.vmem [resolvable:$true] %s71_s28 }
  0x36   :  { %s748_s11 = scalar_lea.hbm %s979_s2, 1024 }
  0x37   :  { %p749_p10 = scmp.ne.s32.totalorder %s979_s2, %s748_s11  ;;  %p752_p11 = scmp.lt.u32.totalorder %s748_s11, %s979_s2 }
  0x39   :  { %p754_p12 = pnand %p752_p11, %p749_p10 }
  0x3b   :  { %757 = shalt.err (!%p754_p12)
}
  0x3c   :  { %s758_s0 = scalar_lea.vmem %s44_s26, 1024  ;;  %p763_p0 = scmp.lt.s32.totalorder %s44_s26, %s44_s26 }
  0x3d   :  { %p759_p13 = scmp.ne.s32.totalorder %s44_s26, %s758_s0  ;;  %p764_p1 = scmp.lt.s32.totalorder %s758_s0, %s758_s0 }
  0x3f   :  { %p765_p2 = por %p764_p1, %p763_p0 }
  0x41   :  { %p766_p3 = pnand %p765_p2, %p759_p13 }
  0x43   :  { %769 = shalt.err (!%p766_p3)
}
  0x44   :  { %49 = dma.hbm_to_vmem [thread:$0]  %s979_s2, 1024, %s44_s26, [#allocation6], %s825_s10, %s825_s10, %s826_s12  }
  0x45   :  { %s770_s19 = scalar_lea.hbm %s983_s6, 2048 }
  0x46   :  { %p771_p4 = scmp.ne.s32.totalorder %s983_s6, %s770_s19  ;;  %p774_p5 = scmp.lt.u32.totalorder %s770_s19, %s983_s6 }
  0x48   :  { %p776_p6 = pnand %p774_p5, %p771_p4 }
  0x4a   :  { %779 = shalt.err (!%p776_p6)
}
  0x4b   :  { %s780_s22 = scalar_lea.vmem %s72_s28, 2048  ;;  %p785_p8 = scmp.lt.s32.totalorder %s72_s28, %s72_s28 }
  0x4c   :  { %p781_p7 = scmp.ne.s32.totalorder %s72_s28, %s780_s22  ;;  %p786_p9 = scmp.lt.s32.totalorder %s780_s22, %s780_s22 }
  0x4e   :  { %p787_p10 = por %p786_p9, %p785_p8 }
  0x50   :  { %p788_p11 = pnand %p787_p10, %p781_p7 }
  0x52   :  { %791 = shalt.err (!%p788_p11)
}
  0x53   :  { %s829_s2 = smov 128   ;;  %s830_s10 = smov 8  }
  0x54   :  { %77 = dma.hbm_to_vmem [thread:$0]  %s983_s6, 2048, %s72_s28, [#allocation9], %s829_s2, %s829_s2, %s830_s10  }
  0x55   :  { %814 = dma.done.wait [#allocation3], 64  }
  0x56   :  { %815 = vsyncadd [#allocation3], 4294967232 }
  0x57   :  { %816 = dma.done.wait [#allocation6], 1152  }
  0x58   :  { %817 = vsyncadd [#allocation6], 4294966144 }
  0x59   :  { %818 = dma.done.wait [#allocation9], 3072  }
  0x5a   :  { %819 = vsyncadd [#allocation9], 4294964224  ;;  %v831_v0 = vmov 0.0   ;;  %vm832_vm0 = vmmov 0   ;;  %v636_v1 = vld [vmem:[#allocation7] sm:$0xff]   ;;  %v637_v2 = vld [vmem:[#allocation7 + $0x8] sm:$0xff]   ;;  %v343_v51 = vlaneseq }
  0x5b   :  { %583 = vmatprep.subr.bf16.mxu0 %v831_v0  ;;  %599 = vmatprep.mubr.msk.bf16.mxu0 %vm832_vm0, %v831_v0  ;;  %v638_v3 = vld [vmem:[#allocation7 + $0x10] sm:$0xff]   ;;  %v644_v4 = vld [vmem:[#allocation8] sm:$0xff]   ;;  %v639_v5 = vld [vmem:[#allocation7 + $0x18] sm:$0xff]   ;;  %v833_v42 = vmov 0   ;;  %s834_s30 = smov [#allocation11]  }
  0x5c   :  { %603 = vmatprep.subr.bf16.mxu1 %v831_v0  ;;  %619 = vmatprep.mubr.msk.bf16.mxu1 %vm832_vm0, %v831_v0  ;;  %v645_v6 = vld [vmem:[#allocation8 + $0x8] sm:$0xff]   ;;  %v640_v7 = vld [vmem:[#allocation7 + $0x20] sm:$0xff]   ;;  %v646_v8 = vld [vmem:[#allocation8 + $0x10] sm:$0xff]   ;;  %v344_v52 = vshrl.u32 %v343_v51, 7  ;;  %s518_s11 = sshll.u32 %s834_s30, 4  ;;  %s519_s11 = int_to_ptr.vmem [resolvable:$true] %s518_s11 }
  0x5d   :  { %584 = vmatpush3.bf16.msra.mxu0 %v636_v1  ;;  %604 = vmatpush3.bf16.msra.mxu1 %v644_v4  ;;  %v641_v9 = vld [vmem:[#allocation7 + $0x28] sm:$0xff]   ;;  %v647_v10 = vld [vmem:[#allocation8 + $0x18] sm:$0xff]   ;;  %v642_v11 = vld [vmem:[#allocation7 + $0x30] sm:$0xff]   ;;  %v479_v1 = vand.u32 127, %v343_v51  ;;  %s792_s1 = scalar_lea.vmem %s519_s11, 128  ;;  %p797_p13 = scmp.lt.s32.totalorder %s519_s11, %s519_s11 }
  0x5e   :  { %585 = vmatprep.subr.bf16.mxu0 %v831_v0  ;;  %605 = vmatprep.subr.bf16.mxu1 %v831_v0  ;;  %v648_v12 = vld [vmem:[#allocation8 + $0x20] sm:$0xff]   ;;  %v643_v13 = vld [vmem:[#allocation7 + $0x38] sm:$0xff]   ;;  %v649_v14 = vld [vmem:[#allocation8 + $0x28] sm:$0xff]   ;;  %v349_v53 = vsub.s32 1, %v344_v52  ;;  %p793_p12 = scmp.ne.s32.totalorder %s519_s11, %s792_s1  ;;  %p798_p0 = scmp.lt.s32.totalorder %s792_s1, %s792_s1 }
  0x5f   :  { %v98_v15 = vld [vmem:[#allocation2] sm:$0xf]  ;;  %v651_v17 = vld [vmem:[#allocation8 + $0x38] sm:$0xff]   ;;  %v652_v18 = vld [vmem:[#allocation10] ss:$8 sps:$4 sm:$0xff]   ;;  %vm480_vm1 = vcmp.lt.s32.totalorder %v479_v1, 4 }
  0x60   :  { %v650_v16 = vld [vmem:[#allocation8 + $0x30] sm:$0xff]   ;;  %v654_v19 = vld [vmem:[#allocation10 + $0x4] ss:$8 sps:$4 sm:$0xff]   ;;  %v658_v23 = vld [vmem:[#allocation10 + $0x20] ss:$8 sps:$4 sm:$0xff]   ;;  %vm509_vm2 = vcmp.eq.s32.totalorder %v479_v1, 4  ;;  %p799_p1 = por %p798_p0, %p797_p13 }
  0x61   :  { %586 = vmatpush3.bf16.msra.mxu0 %v637_v2  ;;  %606 = vmatpush3.bf16.msra.mxu1 %v645_v6  ;;  %v657_v20 = vld [vmem:[#allocation10 + $0x14] ss:$8 sps:$4 sm:$0xff]   ;;  %v655_v21 = vld [vmem:[#allocation10 + $0x10] ss:$8 sps:$4 sm:$0xff]   ;;  %v660_v22 = vld [vmem:[#allocation10 + $0x24] ss:$8 sps:$4 sm:$0xff]  }
  0x62   :  { %587 = vmatprep.subr.bf16.mxu0 %v831_v0  ;;  %607 = vmatprep.subr.bf16.mxu1 %v831_v0  ;;  %v663_v24 = vld [vmem:[#allocation10 + $0x34] ss:$8 sps:$4 sm:$0xff]   ;;  %v661_v25 = vld [vmem:[#allocation10 + $0x30] ss:$8 sps:$4 sm:$0xff]   ;;  %v666_v26 = vld [vmem:[#allocation10 + $0x44] ss:$8 sps:$4 sm:$0xff]   ;;  %p800_p2 = pnand %p799_p1, %p793_p12 }
  0x63   :  { %v664_v27 = vld [vmem:[#allocation10 + $0x40] ss:$8 sps:$4 sm:$0xff]   ;;  %v669_v28 = vld [vmem:[#allocation10 + $0x54] ss:$8 sps:$4 sm:$0xff]   ;;  %v667_v29 = vld [vmem:[#allocation10 + $0x50] ss:$8 sps:$4 sm:$0xff]  }
  0x64   :  { %v672_v30 = vld [vmem:[#allocation10 + $0x64] ss:$8 sps:$4 sm:$0xff]   ;;  %v670_v31 = vld [vmem:[#allocation10 + $0x60] ss:$8 sps:$4 sm:$0xff]   ;;  %v529_v32 = vld [vmem:[%s980_s3] ss:$0 sm:$0xff] }
  0x65   :  { %588 = vmatpush3.bf16.msra.mxu0 %v638_v3  ;;  %608 = vmatpush3.bf16.msra.mxu1 %v646_v8  ;;  %v675_v40 = vld [vmem:[#allocation10 + $0x74] ss:$8 sps:$4 sm:$0xff]   ;;  %v673_v41 = vld [vmem:[#allocation10 + $0x70] ss:$8 sps:$4 sm:$0xff]  }
  0x66   :  { %589 = vmatprep.subr.bf16.mxu0 %v831_v0  ;;  %609 = vmatprep.subr.bf16.mxu1 %v831_v0  ;;  %v538_v43 = vld [vmem:[%s982_s5] ss:$0 sm:$0xff]  ;;  %v481_v55 = vld [vmem:[#allocation5] sm:$0xff] }
  0x67   :  { %v341_v54 = vld [vmem:[%s984_s7] sm:$0x3]  ;;  %v485_v58 = vmul.f32 %v481_v55, %v481_v55 }
  0x68   :  { %v350_v56 = vrot.slane %v341_v54, %v349_v53 }
  0x69   :  { %590 = vmatpush3.bf16.msra.mxu0 %v639_v5  ;;  %610 = vmatpush3.bf16.msra.mxu1 %v647_v10 }
  0x6a   :  { %591 = vmatprep.subr.bf16.mxu0 %v831_v0  ;;  %611 = vmatprep.subr.bf16.mxu1 %v831_v0 }
  0x6d   :  { %592 = vmatpush3.bf16.msra.mxu0 %v640_v7  ;;  %612 = vmatpush3.bf16.msra.mxu1 %v648_v12  ;;  %v345_v7 = vsub.s32 0, %v344_v52 }
  0x6e   :  { %593 = vmatprep.subr.bf16.mxu0 %v831_v0  ;;  %613 = vmatprep.subr.bf16.mxu1 %v831_v0 }
  0x6f   :  { %v346_v8 = vrot.slane %v341_v54, %v345_v7 }
  0x71   :  { %594 = vmatpush3.bf16.msra.mxu0 %v641_v9  ;;  %614 = vmatpush3.bf16.msra.mxu1 %v649_v14 }
  0x72   :  { %595 = vmatprep.subr.bf16.mxu0 %v831_v0  ;;  %615 = vmatprep.subr.bf16.mxu1 %v831_v0 }
  0x75   :  { %596 = vmatpush3.bf16.msra.mxu0 %v642_v11  ;;  %616 = vmatpush3.bf16.msra.mxu1 %v650_v16 }
  0x76   :  { %597 = vmatprep.subr.bf16.mxu0 %v831_v0  ;;  %617 = vmatprep.subr.bf16.mxu1 %v831_v0  ;;  %v486_v0 = vmul.f32 -0.5, %v485_v58 }
  0x79   :  { %598 = vmatpush3.bf16.msra.mxu0 %v643_v13  ;;  %618 = vmatpush3.bf16.msra.mxu1 %v651_v17 }
  0x7a   :  { %433 = vmatprep.subr.bf16.mxu0 %v654_v19 }
  0x7c   :  { %600 = vmatmul.mubr.bf16.vlgmr.msra.gmra.mrb[0].mxu0 %v98_v15  ;;  %v564_v15 = vld [vmem:[%s985_s8] ss:$0 sm:$0xff] }
  0x7d   :  { %434 = vmatpush1.bf16.msra.mxu0 %v652_v18  ;;  %465 = vmatprep.mubr.bf16.mxu0 %v833_v42 }
  0x7e   :  { %435 = vmatprep.subr.bf16.mxu0 %v657_v20 }
  0x81   :  { %436 = vmatpush1.bf16.msra.mxu0 %v655_v21 }
  0x82   :  { %437 = vmatprep.subr.bf16.mxu0 %v660_v22 }
  0x85   :  { %438 = vmatpush1.bf16.msra.mxu0 %v658_v23 }
  0x86   :  { %439 = vmatprep.subr.bf16.mxu0 %v663_v24 }
  0x89   :  { %440 = vmatpush1.bf16.msra.mxu0 %v661_v25 }
  0x8a   :  { %441 = vmatprep.subr.bf16.mxu0 %v666_v26 }
  0x8d   :  { %442 = vmatpush1.bf16.msra.mxu0 %v664_v27 }
  0x8e   :  { %443 = vmatprep.subr.bf16.mxu0 %v669_v28 }
  0x91   :  { %444 = vmatpush1.bf16.msra.mxu0 %v667_v29 }
  0x92   :  { %445 = vmatprep.subr.bf16.mxu0 %v672_v30 }
  0x95   :  { %446 = vmatpush1.bf16.msra.mxu0 %v670_v31 }
  0x96   :  { %447 = vmatprep.subr.bf16.mxu0 %v675_v40 }
  0x99   :  { %448 = vmatpush1.bf16.msra.mxu0 %v673_v41 }
 0x14f   :  { %v204_v33 = vpop.f32.mrb[0].mxu0 }
 0x150   :  { %v205_v34 = vadd.f32 %v529_v32, %v204_v33  ;;  %v601_v35 = vpop.f32.mrb[1].mxu0 }
 0x151   :  { %v207_v36 = vpop.f32.mrb[2].mxu0 }
 0x152   :  { %v210_v37 = vmax.f32 %v205_v34, 0.0  ;;  %v602_v38 = vpop.f32.mrb[3].mxu0 }
 0x154   :  { %v211_v39 = vpack.c.bf16 %v210_v37, %v210_v37 }
 0x156   :  { %620 = vmatmul.mubr.bf16.vlgmr.msra.gmra.mrb[0].mxu1 %v211_v39 }
 0x229   :  { %v317_v44 = vpop.f32.mrb[0].mxu1 }
 0x22a   :  { %v318_v45 = vadd.f32 %v538_v43, %v317_v44  ;;  %v621_v46 = vpop.f32.mrb[1].mxu1 }
 0x22b   :  { %v320_v47 = vpop.f32.mrb[2].mxu1 }
 0x22c   :  { %v323_v48 = vmax.f32 %v318_v45, 0.0  ;;  %v622_v49 = vpop.f32.mrb[3].mxu1 }
 0x22e   :  { %v324_v50 = vpack.c.bf16 %v323_v48, %v323_v48 }
 0x230   :  { %466 = vmatmul.mubr.bf16.vlgmr.msra.gmra.mrb[4].mxu0 %v324_v50 }
 0x303   :  { %v467_v57 = vpop.f32.mrb[4].mxu0 }
 0x304   :  { %v469_v59 = vpop.f32.mrb[5].mxu0  ;;  %v468_v10 = vadd.f32 %v467_v57, %v346_v8 }
 0x305   :  { %v470_v60 = vadd.f32 %v469_v59, %v350_v56  ;;  %v471_v61 = vpop.f32.mrb[6].mxu0 }
 0x306   :  { %v472_v62 = vpop.f32.mrb[7].mxu0 }
 0x307   :  { %v474_v63 = vmax.f32 %v470_v60, -20.0 }
 0x309   :  { %v475_v2 = vmin.f32 %v474_v63, 2.0 }
 0x30b   :  { %v476_v3 = vmul.f32 1.442695, %v475_v2  ;;  %v487_v4 = vsub.f32 %v486_v0, %v475_v2 }
 0x30d   :  { %676 = vpow2.f32 %v476_v3  ;;  %v563_v5 = vadd.f32 -0.9189385, %v487_v4 }
 0x30f   :  { %v489_v6 = vsel %vm480_vm1, %v563_v5, 0.0 }
 0x310   :  { %490 = vadd.xlane.f32.xlu0 %v489_v6 }
 0x317   :  { %v677_v9 = vpop.eup %676 }
 0x318   :  { %v482_v11 = vmul.f32 %v677_v9, %v481_v55 }
 0x31a   :  { %v483_v12 = vadd.f32 %v482_v11, %v468_v10 }
 0x31c   :  { %678 = vtanh.f32 %v483_v12 }
 0x326   :  { %v679_v13 = vpop.eup %678 }
 0x327   :  { %v493_v14 = vmul.f32 %v679_v13, %v679_v13 }
 0x329   :  { %v494_v16 = vsub.f32 1.0, %v493_v14 }
 0x32b   :  { %v501_v17 = vmul.f32 %v564_v15, %v494_v16 }
 0x32d   :  { %v502_v18 = vadd.f32 1.1920929e-07, %v501_v17 }
 0x32f   :  { %680 = vlog2.f32 %v502_v18 }
 0x339   :  { %v681_v19 = vpop.eup %680 }
 0x33a   :  { %v504_v20 = vmul.f32 0.6931472, %v681_v19 }
 0x33c   :  { %v505_v21 = vsel %vm480_vm1, %v504_v20, 0.0 }
 0x33d   :  { %506 = vadd.xlane.f32.xlu0 %v505_v21 }
 0x39d   :  { %v491_v22 = vpop.xlane.xlu0 %490 }
 0x3ca   :  { %v507_v23 = vpop.xlane.xlu0 %506 }
 0x3cb   :  { %v508_v24 = vsub.f32 %v491_v22, %v507_v23 }
 0x3cd   :  { %v510_v25 = vsel %vm509_vm2, %v508_v24, %v679_v13 }
 0x3ce   :  { %511 = vst [vmem:[#allocation11] sm:$0xff] %v510_v25 }
 0x3cf   :  { %803 = shalt.err (!%p800_p2)
}
 0x3d0   :  { %s804_s14 = scalar_lea.hbm %s986_s9, 128 }
 0x3d1   :  { %p805_p3 = scmp.ne.s32.totalorder %s986_s9, %s804_s14  ;;  %p808_p4 = scmp.lt.u32.totalorder %s804_s14, %s986_s9 }
 0x3d3   :  { %p810_p5 = pnand %p808_p4, %p805_p3 }
 0x3d5   :  { %813 = shalt.err (!%p810_p5)
}
 0x3d6   :  { %521 = dma.vmem_to_hbm [thread:$0]  %s519_s11, 128, %s986_s9, [#allocation4]  }
 0x3d7   :  { %820 = dma.done.wait [#allocation4], 128  }
 0x3d8   :  { %821 = vsyncadd [#allocation4], 4294967168 }
 0x3d9   :  { %525 = vsyncpa [#allocation3], 1 }
 0x3da   :  { %526 = vsyncpa [#allocation6], 1 }
 0x3db   :  { %527 = vsyncpa [#allocation9], 1 }
 0x3dc   :  { %528 = vsyncpa [#allocation4], 1 }

</bundles_post_ra>
